<compile_context>
chip_gen: v7x
topology: tpu7x:2x2x1
jax: 0.10.0
libtpu: 0.0.40
codegen_flags: <defaults>
</compile_context>

<pallas_src>
import functools

import jax
import jax.numpy as jnp
from jax.experimental import pallas as pl
from jax.experimental.pallas import tpu as pltpu


_MAX_TOKENS_PER_TILE = 512      # rows of output per grid step (multiple of 8)
_MAX_INFLIGHT_GATHERS = 16      # HBM path: bounded DMA / semaphore ring depth


def _round_up(x, m):
    return (x + m - 1) // m * m


def _vmem_capacity_bytes():
    try:
        return int(pltpu.get_tpu_info().vmem_capacity_bytes)
    except Exception:
        return 64 * 1024 * 1024   # v7x per-core VMEM: conservative lower bound


def _program_bj(batch_major):
    if batch_major:
        return pl.program_id(0), pl.program_id(1)
    return pl.program_id(1), pl.program_id(0)


def _projected_row(emean_ref, w_ref, bias_ref, b):
    # elmo_proj(mean of the 3 ELMo layers) for sentence b: (1, E) @ (E, D) + b
    e = emean_ref[pl.ds(b, 1), :]
    return jnp.dot(e, w_ref[...], preferred_element_type=jnp.float32) + bias_ref[...]


# ---------------------------------------------------------------------------
# Path A: embedding table resident in VMEM -> gather = dynamic in-VMEM loads.
# ---------------------------------------------------------------------------
def _gather_add_vmem_kernel(ids_ref,      # SMEM (B*T_pad,) int32  (scalar prefetch)
                            table_ref,    # VMEM (V, D) f32, resident
                            emean_ref,    # VMEM (B, E) f32, resident
                            w_ref,        # VMEM (E, D) f32, resident
                            bias_ref,     # VMEM (1, D) f32, resident
                            out_ref,      # VMEM (TB, D) f32 (batch dim squeezed)
                            *, tb, t_pad, batch_major):
    b, j = _program_bj(batch_major)
    proj = _projected_row(emean_ref, w_ref, bias_ref, b)     # (1, D)
    base = b * t_pad + j * tb

    def row(r):
        tok = ids_ref[base + r]
        out_ref[pl.ds(r, 1), :] = table_ref[pl.ds(tok, 1), :] + proj

    if tb <= 64:
        for r in range(tb):                                   # static unroll
            row(r)
    else:
        def body(r, carry):
            row(r)
            return carry
        jax.lax.fori_loop(0, tb, body, 0, unroll=8)


# ---------------------------------------------------------------------------
# Path B: table stays in HBM -> per-row DMA gather through a bounded ring of
# in-flight copies sharing a small semaphore ring, then one bulk add + store.
# ---------------------------------------------------------------------------
def _gather_add_hbm_kernel(ids_ref,       # SMEM (B*T_pad,) int32  (scalar prefetch)
                           table_hbm,     # HBM  (V, D) f32 (pl.ANY)
                           emean_ref,     # VMEM (B, E) f32, resident
                           w_ref,         # VMEM (E, D) f32, resident
                           bias_ref,      # VMEM (1, D) f32, resident
                           out_ref,       # VMEM (TB, D) f32 (batch dim squeezed)
                           rows_vmem,     # VMEM scratch (TB, D) f32
                           sems,          # DMA semaphores (n_sem,)
                           *, tb, t_pad, batch_major, n_sem):
    b, j = _program_bj(batch_major)
    base = b * t_pad + j * tb

    def copy_for(r):
        tok = ids_ref[base + r]
        return pltpu.make_async_copy(
            table_hbm.at[pl.ds(tok, 1), :],
            rows_vmem.at[pl.ds(r, 1), :],
            sems.at[r % n_sem],
        )

    # Prime a bounded ring of in-flight row gathers (shared semaphore ring).
    for r in range(n_sem):
        copy_for(r).start()

    # The tiny ELMo projection matmul overlaps with the in-flight gathers.
    proj = _projected_row(emean_ref, w_ref, bias_ref, b)     # (1, D)

    if tb <= 64:
        # Fully static rolling wait/start (small tiles).
        for r in range(tb):
            copy_for(r).wait()
            if r + n_sem < tb:
                copy_for(r + n_sem).start()
    else:
        def body(r, carry):
            copy_for(r).wait()

            @pl.when(r + n_sem < tb)
            def _():
                copy_for(r + n_sem).start()
            return carry

        jax.lax.fori_loop(0, tb, body, 0, unroll=8)

    # Single sublane-dense add + store once every row has landed.
    out_ref[...] = rows_vmem[...] + proj


# ---------------------------------------------------------------------------
# Wrapper
# ---------------------------------------------------------------------------
def wordrep_forward(sentence, embed_table, elmo, proj_w, proj_b,
                    *, force_hbm_gather=False):
    """Pallas WordRep forward.

    sentence    : (B, T)     int32 token ids
    embed_table : (V, D)     f32   nn.Embedding weight
    elmo        : (3, B, E)  f32   3 ELMo layers, per-sentence vectors (E=1024)
    proj_w      : (E, D)     f32   elmo_proj weight stored transposed (x @ W)
    proj_b      : (1, D)     f32   elmo_proj bias
    returns     : (B, T, D)  f32   word_embeds + broadcast(projected ELMo mean)
    """
    B, T = sentence.shape
    V, D = embed_table.shape
    E = proj_w.shape[0]
    assert elmo.shape == (3, B, E), elmo.shape

    # Token-tile size: one tile per sentence when T is small, else 512-row tiles.
    T8 = _round_up(T, 8)
    TB = T8 if T8 <= _MAX_TOKENS_PER_TILE else _MAX_TOKENS_PER_TILE
    T_pad = _round_up(T, TB)
    n_tiles = T_pad // TB

    # ---- wrapper-side prep (tiny; no table copies) ----
    # Clamp ids so a stray out-of-range id can never drive an OOB gather
    # (torch nn.Embedding would raise instead of clamping).
    ids = jnp.clip(sentence, 0, V - 1).astype(jnp.int32)
    if T_pad != T:
        ids = jnp.pad(ids, ((0, 0), (0, T_pad - T)))
    ids_flat = ids.reshape(B * T_pad)                       # 1-D -> compact SMEM

    if embed_table.dtype != jnp.float32:
        embed_table = embed_table.astype(jnp.float32)
    elmo_mean = jnp.mean(elmo.astype(jnp.float32), axis=0)  # (B, E)
    w = proj_w.astype(jnp.float32)                          # (E, D)
    bias = jnp.reshape(proj_b, (1, D)).astype(jnp.float32)  # (1, D)

    # ---- choose table strategy from VMEM capacity ----
    itemsize = 4
    table_bytes = V * D * itemsize
    out_block_bytes = TB * D * itemsize
    resident_bytes = (B * E + E * D + D) * itemsize
    capacity = _vmem_capacity_bytes()

    vmem_needed_resident = 2 * (table_bytes + out_block_bytes + resident_bytes) + (1 << 20)
    use_resident_table = (not force_hbm_gather) and (
        vmem_needed_resident <= int(0.7 * capacity))

    if use_resident_table:
        vmem_needed = vmem_needed_resident
    else:
        vmem_needed = (2 * (out_block_bytes + resident_bytes)
                       + TB * D * itemsize + (1 << 20))
    vmem_limit = int(min(capacity - (2 << 20),
                         max(32 << 20, vmem_needed + (8 << 20))))

    # ---- grid: both axes parallel; larger axis leads for megacore sharding ----
    batch_major = B >= n_tiles
    grid = (B, n_tiles) if batch_major else (n_tiles, B)
    if batch_major:
        out_map = lambda g0, g1, ids_sm: (g0, g1, 0)
    else:
        out_map = lambda g0, g1, ids_sm: (g1, g0, 0)
    res2 = lambda g0, g1, ids_sm: (0, 0)                    # resident operands

    common_specs = [
        pl.BlockSpec((B, E), res2),                         # elmo mean (resident)
        pl.BlockSpec((E, D), res2),                         # proj weight (resident)
        pl.BlockSpec((1, D), res2),                         # proj bias (resident)
    ]

    if use_resident_table:
        table_spec = pl.BlockSpec((V, D), res2)             # whole table in VMEM
        scratch_shapes = []
        kern = functools.partial(_gather_add_vmem_kernel,
                                 tb=TB, t_pad=T_pad, batch_major=batch_major)
        table_traffic = table_bytes
    else:
        table_spec = pl.BlockSpec(memory_space=pl.ANY)      # table stays in HBM
        n_sem = min(_MAX_INFLIGHT_GATHERS, TB)
        scratch_shapes = [
            pltpu.VMEM((TB, D), jnp.float32),
            pltpu.SemaphoreType.DMA((n_sem,)),
        ]
        kern = functools.partial(_gather_add_hbm_kernel,
                                 tb=TB, t_pad=T_pad, batch_major=batch_major,
                                 n_sem=n_sem)
        table_traffic = B * T_pad * D * itemsize

    grid_spec = pltpu.PrefetchScalarGridSpec(
        num_scalar_prefetch=1,
        grid=grid,
        in_specs=[table_spec] + common_specs,
        out_specs=pl.BlockSpec((None, TB, D), out_map),
        scratch_shapes=scratch_shapes,
    )

    n_steps = B * n_tiles
    cost = pl.CostEstimate(
        flops=2 * E * D * n_steps + B * T_pad * D,
        transcendentals=0,
        bytes_accessed=(B * T_pad * 4                       # ids
                        + (B * E + E * D + D) * 4           # elmo mean / W / bias
                        + table_traffic                     # table reads
                        + B * T_pad * D * 4),               # output writes
    )

    out_padded = pl.pallas_call(
        kern,
        out_shape=jax.ShapeDtypeStruct((B, T_pad, D), jnp.float32),
        grid_spec=grid_spec,
        compiler_params=pltpu.CompilerParams(
            dimension_semantics=("parallel", "parallel"),
            vmem_limit_bytes=vmem_limit,
        ),
        cost_estimate=cost,
    )(ids_flat, embed_table, elmo_mean, w, bias)

    if T_pad != T:
        out_padded = out_padded[:, :T, :]
    return out_padded


def wordrep_reference(sentence, embed_table, elmo, proj_w, proj_b):
    words = embed_table[sentence]                   # (B, T, D)
    elmo_mean = elmo.mean(axis=0)                   # (B, E)
    projected = elmo_mean @ proj_w + proj_b         # (B, D)
    return words + projected[:, None, :]


if __name__ == "__main__":
    # Small, forward-consistent shapes.
    B, T = 2, 8          # batch of sentences, tokens per sentence
    V, D = 50, 32        # vocab_size, word_embed_dim
    ELMO_DIM = 1024      # fixed by the module (elmo_proj = Linear(1024, D))

    key = jax.random.PRNGKey(0)
    k_ids, k_tab, k_elmo, k_w, k_b = jax.random.split(key, 5)

    sentence = jax.random.randint(k_ids, (B, T), 0, V, dtype=jnp.int32)
    embed_table = jax.random.normal(k_tab, (V, D), dtype=jnp.float32) * 0.1
    elmo = jax.random.normal(k_elmo, (3, B, ELMO_DIM), dtype=jnp.float32)
    # torch Linear(1024, D) weight is (D, 1024); store its transpose for x @ W.
    proj_w = jax.random.normal(k_w, (ELMO_DIM, D), dtype=jnp.float32) * 0.02
    proj_b = jax.random.normal(k_b, (1, D), dtype=jnp.float32) * 0.01

    ref = wordrep_reference(sentence, embed_table, elmo, proj_w, proj_b)

    # Path A: VMEM-resident table (auto-selected at these sizes).
    out_a = jax.block_until_ready(
        wordrep_forward(sentence, embed_table, elmo, proj_w, proj_b))
    assert out_a.shape == (B, T, D), out_a.shape
    assert jnp.allclose(out_a, ref, atol=1e-4, rtol=1e-4), "VMEM-table path mismatch"

    # Path B: HBM-resident table + bounded DMA-ring gather (the large-vocab /
    # v7x path), exercised here for correctness as well.
    out_b = jax.block_until_ready(
        wordrep_forward(sentence, embed_table, elmo, proj_w, proj_b,
                        force_hbm_gather=True))
    assert out_b.shape == (B, T, D), out_b.shape
    assert jnp.allclose(out_b, ref, atol=1e-4, rtol=1e-4), "HBM-gather path mismatch"

    print("KERNEL_OK")
</pallas_src>

<mosaic_0001>
module attributes {stable_mosaic.version = 11 : i64} {
  func.func @_gather_add_vmem_kernel(%arg0: i32, %arg1: i32, %arg2: memref<16xi32, #tpu.memory_space<smem>>, %arg3: memref<50x32xf32, #tpu.memory_space<vmem>>, %arg4: memref<2x1024xf32, #tpu.memory_space<vmem>>, %arg5: memref<1024x32xf32, #tpu.memory_space<vmem>>, %arg6: memref<1x32xf32, #tpu.memory_space<vmem>>, %arg7: memref<1x8x32xf32, #tpu.memory_space<vmem>>) attributes {dimension_semantics = [#tpu.dimension_semantics<parallel>, #tpu.dimension_semantics<parallel>], iteration_bounds = array<i64: 2, 1>, scalar_prefetch = 1 : i64, scratch_operands = 0 : i64, tpu.core_type = #tpu.core_type<tc>, window_params = [{pipeline_mode = #tpu.pipeline_mode<synchronous>, transform_indices = @transform_0, window_bounds = array<i64: 50, 32>}, {pipeline_mode = #tpu.pipeline_mode<synchronous>, transform_indices = @transform_1, window_bounds = array<i64: 2, 1024>}, {pipeline_mode = #tpu.pipeline_mode<synchronous>, transform_indices = @transform_2, window_bounds = array<i64: 1024, 32>}, {pipeline_mode = #tpu.pipeline_mode<synchronous>, transform_indices = @transform_3, window_bounds = array<i64: 1, 32>}, {transform_indices = @transform_4, window_bounds = array<i64: 1, 8, 32>}]} {
    %0 = arith.index_cast %arg0 : i32 to index
    %c0 = arith.constant 0 : index
    %1 = vector.load %arg4[%0, %c0] : memref<2x1024xf32, #tpu.memory_space<vmem>>, vector<1x1024xf32>
    %c0_0 = arith.constant 0 : index
    %c0_1 = arith.constant 0 : index
    %2 = vector.load %arg5[%c0_0, %c0_1] : memref<1024x32xf32, #tpu.memory_space<vmem>>, vector<1024x32xf32>
    %cst = arith.constant dense<0.000000e+00> : vector<1x32xf32>
    %3 = tpu.matmul %1, %2, %cst {dimension_numbers = #tpu.dot_dimension_numbers<[1], [0], [0], [1], [0, 0, 1, 1], [], []>} : vector<1x1024xf32>, vector<1024x32xf32>, vector<1x32xf32> -> vector<1x32xf32>
    %c0_2 = arith.constant 0 : index
    %c0_3 = arith.constant 0 : index
    %4 = vector.load %arg6[%c0_2, %c0_3] : memref<1x32xf32, #tpu.memory_space<vmem>>, vector<1x32xf32>
    %5 = arith.addf %3, %4 : vector<1x32xf32>
    %c8_i32 = arith.constant 8 : i32
    %6 = arith.muli %arg0, %c8_i32 : i32
    %c8_i32_4 = arith.constant 8 : i32
    %7 = arith.muli %arg1, %c8_i32_4 : i32
    %8 = arith.addi %6, %7 : i32
    %c0_i32 = arith.constant 0 : i32
    %9 = arith.addi %8, %c0_i32 : i32
    %10 = arith.index_cast %9 : i32 to index
    %11 = memref.load %arg2[%10] : memref<16xi32, #tpu.memory_space<smem>>
    %12 = arith.index_cast %11 : i32 to index
    %c0_5 = arith.constant 0 : index
    %13 = vector.load %arg3[%12, %c0_5] : memref<50x32xf32, #tpu.memory_space<vmem>>, vector<1x32xf32>
    %14 = arith.addf %13, %5 : vector<1x32xf32>
    %c0_6 = arith.constant 0 : index
    %c0_7 = arith.constant 0 : index
    %c0_8 = arith.constant 0 : index
    %15 = vector.load %arg7[%c0_6, %c0_7, %c0_8] : memref<1x8x32xf32, #tpu.memory_space<vmem>>, vector<1x1x32xf32>
    %16 = vector.shape_cast %15 : vector<1x1x32xf32> to vector<1x32xf32>
    %17 = vector.shape_cast %14 : vector<1x32xf32> to vector<1x1x32xf32>
    tpu.vector_store %arg7[%c0_6, %c0_7, %c0_8], %17 {strides = array<i32>} : memref<1x8x32xf32, #tpu.memory_space<vmem>>, vector<1x1x32xf32>,
    %c1_i32 = arith.constant 1 : i32
    %18 = arith.addi %8, %c1_i32 : i32
    %19 = arith.index_cast %18 : i32 to index
    %20 = memref.load %arg2[%19] : memref<16xi32, #tpu.memory_space<smem>>
    %21 = arith.index_cast %20 : i32 to index
    %c0_9 = arith.constant 0 : index
    %22 = vector.load %arg3[%21, %c0_9] : memref<50x32xf32, #tpu.memory_space<vmem>>, vector<1x32xf32>
    %23 = arith.addf %22, %5 : vector<1x32xf32>
    %c0_10 = arith.constant 0 : index
    %c1 = arith.constant 1 : index
    %c0_11 = arith.constant 0 : index
    %24 = vector.load %arg7[%c0_10, %c1, %c0_11] : memref<1x8x32xf32, #tpu.memory_space<vmem>>, vector<1x1x32xf32>
    %25 = vector.shape_cast %24 : vector<1x1x32xf32> to vector<1x32xf32>
    %26 = vector.shape_cast %23 : vector<1x32xf32> to vector<1x1x32xf32>
    tpu.vector_store %arg7[%c0_10, %c1, %c0_11], %26 {strides = array<i32>} : memref<1x8x32xf32, #tpu.memory_space<vmem>>, vector<1x1x32xf32>,
    %c2_i32 = arith.constant 2 : i32
    %27 = arith.addi %8, %c2_i32 : i32
    %28 = arith.index_cast %27 : i32 to index
    %29 = memref.load %arg2[%28] : memref<16xi32, #tpu.memory_space<smem>>
    %30 = arith.index_cast %29 : i32 to index
    %c0_12 = arith.constant 0 : index
    %31 = vector.load %arg3[%30, %c0_12] : memref<50x32xf32, #tpu.memory_space<vmem>>, vector<1x32xf32>
    %32 = arith.addf %31, %5 : vector<1x32xf32>
    %c0_13 = arith.constant 0 : index
    %c2 = arith.constant 2 : index
    %c0_14 = arith.constant 0 : index
    %33 = vector.load %arg7[%c0_13, %c2, %c0_14] : memref<1x8x32xf32, #tpu.memory_space<vmem>>, vector<1x1x32xf32>
    %34 = vector.shape_cast %33 : vector<1x1x32xf32> to vector<1x32xf32>
    %35 = vector.shape_cast %32 : vector<1x32xf32> to vector<1x1x32xf32>
    tpu.vector_store %arg7[%c0_13, %c2, %c0_14], %35 {strides = array<i32>} : memref<1x8x32xf32, #tpu.memory_space<vmem>>, vector<1x1x32xf32>,
    %c3_i32 = arith.constant 3 : i32
    %36 = arith.addi %8, %c3_i32 : i32
    %37 = arith.index_cast %36 : i32 to index
    %38 = memref.load %arg2[%37] : memref<16xi32, #tpu.memory_space<smem>>
    %39 = arith.index_cast %38 : i32 to index
    %c0_15 = arith.constant 0 : index
    %40 = vector.load %arg3[%39, %c0_15] : memref<50x32xf32, #tpu.memory_space<vmem>>, vector<1x32xf32>
    %41 = arith.addf %40, %5 : vector<1x32xf32>
    %c0_16 = arith.constant 0 : index
    %c3 = arith.constant 3 : index
    %c0_17 = arith.constant 0 : index
    %42 = vector.load %arg7[%c0_16, %c3, %c0_17] : memref<1x8x32xf32, #tpu.memory_space<vmem>>, vector<1x1x32xf32>
    %43 = vector.shape_cast %42 : vector<1x1x32xf32> to vector<1x32xf32>
    %44 = vector.shape_cast %41 : vector<1x32xf32> to vector<1x1x32xf32>
    tpu.vector_store %arg7[%c0_16, %c3, %c0_17], %44 {strides = array<i32>} : memref<1x8x32xf32, #tpu.memory_space<vmem>>, vector<1x1x32xf32>,
    %c4_i32 = arith.constant 4 : i32
    %45 = arith.addi %8, %c4_i32 : i32
    %46 = arith.index_cast %45 : i32 to index
    %47 = memref.load %arg2[%46] : memref<16xi32, #tpu.memory_space<smem>>
    %48 = arith.index_cast %47 : i32 to index
    %c0_18 = arith.constant 0 : index
    %49 = vector.load %arg3[%48, %c0_18] : memref<50x32xf32, #tpu.memory_space<vmem>>, vector<1x32xf32>
    %50 = arith.addf %49, %5 : vector<1x32xf32>
    %c0_19 = arith.constant 0 : index
    %c4 = arith.constant 4 : index
    %c0_20 = arith.constant 0 : index
    %51 = vector.load %arg7[%c0_19, %c4, %c0_20] : memref<1x8x32xf32, #tpu.memory_space<vmem>>, vector<1x1x32xf32>
    %52 = vector.shape_cast %51 : vector<1x1x32xf32> to vector<1x32xf32>
    %53 = vector.shape_cast %50 : vector<1x32xf32> to vector<1x1x32xf32>
    tpu.vector_store %arg7[%c0_19, %c4, %c0_20], %53 {strides = array<i32>} : memref<1x8x32xf32, #tpu.memory_space<vmem>>, vector<1x1x32xf32>,
    %c5_i32 = arith.constant 5 : i32
    %54 = arith.addi %8, %c5_i32 : i32
    %55 = arith.index_cast %54 : i32 to index
    %56 = memref.load %arg2[%55] : memref<16xi32, #tpu.memory_space<smem>>
    %57 = arith.index_cast %56 : i32 to index
    %c0_21 = arith.constant 0 : index
    %58 = vector.load %arg3[%57, %c0_21] : memref<50x32xf32, #tpu.memory_space<vmem>>, vector<1x32xf32>
    %59 = arith.addf %58, %5 : vector<1x32xf32>
    %c0_22 = arith.constant 0 : index
    %c5 = arith.constant 5 : index
    %c0_23 = arith.constant 0 : index
    %60 = vector.load %arg7[%c0_22, %c5, %c0_23] : memref<1x8x32xf32, #tpu.memory_space<vmem>>, vector<1x1x32xf32>
    %61 = vector.shape_cast %60 : vector<1x1x32xf32> to vector<1x32xf32>
    %62 = vector.shape_cast %59 : vector<1x32xf32> to vector<1x1x32xf32>
    tpu.vector_store %arg7[%c0_22, %c5, %c0_23], %62 {strides = array<i32>} : memref<1x8x32xf32, #tpu.memory_space<vmem>>, vector<1x1x32xf32>,
    %c6_i32 = arith.constant 6 : i32
    %63 = arith.addi %8, %c6_i32 : i32
    %64 = arith.index_cast %63 : i32 to index
    %65 = memref.load %arg2[%64] : memref<16xi32, #tpu.memory_space<smem>>
    %66 = arith.index_cast %65 : i32 to index
    %c0_24 = arith.constant 0 : index
    %67 = vector.load %arg3[%66, %c0_24] : memref<50x32xf32, #tpu.memory_space<vmem>>, vector<1x32xf32>
    %68 = arith.addf %67, %5 : vector<1x32xf32>
    %c0_25 = arith.constant 0 : index
    %c6 = arith.constant 6 : index
    %c0_26 = arith.constant 0 : index
    %69 = vector.load %arg7[%c0_25, %c6, %c0_26] : memref<1x8x32xf32, #tpu.memory_space<vmem>>, vector<1x1x32xf32>
    %70 = vector.shape_cast %69 : vector<1x1x32xf32> to vector<1x32xf32>
    %71 = vector.shape_cast %68 : vector<1x32xf32> to vector<1x1x32xf32>
    tpu.vector_store %arg7[%c0_25, %c6, %c0_26], %71 {strides = array<i32>} : memref<1x8x32xf32, #tpu.memory_space<vmem>>, vector<1x1x32xf32>,
    %c7_i32 = arith.constant 7 : i32
    %72 = arith.addi %8, %c7_i32 : i32
    %73 = arith.index_cast %72 : i32 to index
    %74 = memref.load %arg2[%73] : memref<16xi32, #tpu.memory_space<smem>>
    %75 = arith.index_cast %74 : i32 to index
    %c0_27 = arith.constant 0 : index
    %76 = vector.load %arg3[%75, %c0_27] : memref<50x32xf32, #tpu.memory_space<vmem>>, vector<1x32xf32>
    %77 = arith.addf %76, %5 : vector<1x32xf32>
    %c0_28 = arith.constant 0 : index
    %c7 = arith.constant 7 : index
    %c0_29 = arith.constant 0 : index
    %78 = vector.load %arg7[%c0_28, %c7, %c0_29] : memref<1x8x32xf32, #tpu.memory_space<vmem>>, vector<1x1x32xf32>
    %79 = vector.shape_cast %78 : vector<1x1x32xf32> to vector<1x32xf32>
    %80 = vector.shape_cast %77 : vector<1x32xf32> to vector<1x1x32xf32>
    tpu.vector_store %arg7[%c0_28, %c7, %c0_29], %80 {strides = array<i32>} : memref<1x8x32xf32, #tpu.memory_space<vmem>>, vector<1x1x32xf32>,
    return
  }
  func.func @transform_0(%arg0: i32, %arg1: i32, %arg2: memref<16xi32, #tpu.memory_space<smem>>) -> (i32, i32) {
    %c0_i32 = arith.constant 0 : i32
    %c0_i32_0 = arith.constant 0 : i32
    %c0_i32_1 = arith.constant 0 : i32
    return %c0_i32, %c0_i32_0 : i32, i32
  }
  func.func @transform_1(%arg0: i32, %arg1: i32, %arg2: memref<16xi32, #tpu.memory_space<smem>>) -> (i32, i32) {
    %c0_i32 = arith.constant 0 : i32
    %c0_i32_0 = arith.constant 0 : i32
    %c0_i32_1 = arith.constant 0 : i32
    return %c0_i32, %c0_i32_0 : i32, i32
  }
  func.func @transform_2(%arg0: i32, %arg1: i32, %arg2: memref<16xi32, #tpu.memory_space<smem>>) -> (i32, i32) {
    %c0_i32 = arith.constant 0 : i32
    %c0_i32_0 = arith.constant 0 : i32
    %c0_i32_1 = arith.constant 0 : i32
    return %c0_i32, %c0_i32_0 : i32, i32
  }
  func.func @transform_3(%arg0: i32, %arg1: i32, %arg2: memref<16xi32, #tpu.memory_space<smem>>) -> (i32, i32) {
    %c0_i32 = arith.constant 0 : i32
    %c0_i32_0 = arith.constant 0 : i32
    %c0_i32_1 = arith.constant 0 : i32
    return %c0_i32, %c0_i32_0 : i32, i32
  }
  func.func @transform_4(%arg0: i32, %arg1: i32, %arg2: memref<16xi32, #tpu.memory_space<smem>>) -> (i32, i32, i32) {
    %c0_i32 = arith.constant 0 : i32
    %c0_i32_0 = arith.constant 0 : i32
    return %arg0, %arg1, %c0_i32 : i32, i32, i32
  }
}

</mosaic_0001>

<bundles_post_ra>
// kernel: tpu_custom_call.1
= control target key start
LH: loop header
LB: loop body
LE: loop exit
PB: predicated region body
PF: predicated region fallthrough
CT: control target
= control target key end

     0   :  { %s1820_s0 = inlined_call_operand.vmem [shape: s32[16], index: 0, kind: input, shape index: {}]   ;;  %s1821_s1 = inlined_call_operand.vmem [shape: f32[50,32], index: 1, kind: input, shape index: {}]   ;;  %s1822_s2 = inlined_call_operand.vmem [shape: f32[2,1024], index: 2, kind: input, shape index: {}]   ;;  %s1823_s3 = inlined_call_operand.vmem [shape: f32[1024,32], index: 3, kind: input, shape index: {}]   ;;  %s1824_s4 = inlined_call_operand.vmem [shape: f32[1,32], index: 4, kind: input, shape index: {}]   ;;  %s1825_s5 = inlined_call_operand.hbm [shape: f32[2,8,32], index: 5, kind: output, shape index: {}]  }
   0x1   :  { %1830 = sst [smem:[#allocation12_spill]] %s1822_s2  ;;  %s10_s20 = sshll.u32 %s1820_s0, 4  ;;  %s11_s20 = int_to_ptr.vmem [resolvable:$true] %s10_s20 }
   0x2   :  { %1831 = sst [smem:[#allocation13_spill]] %s1823_s3  ;;  %s1126_s21 = scalar_lea.vmem %s11_s20, 16 }
   0x3   :  { %1832 = sst [smem:[#allocation14_spill]] %s1824_s4  ;;  %p1127_p0 = scmp.ne.s32.totalorder %s11_s20, %s1126_s21 }
   0x4   :  { %p1131_p1 = scmp.lt.s32.totalorder %s11_s20, %s11_s20  ;;  %p1132_p2 = scmp.lt.s32.totalorder %s1126_s21, %s1126_s21 }
   0x6   :  { %p1133_p3 = por %p1132_p2, %p1131_p1 }
   0x8   :  { %p1134_p4 = pnand %p1133_p3, %p1127_p0 }
   0xa   :  { %1137 = shalt.err (!%p1134_p4)  }
   0xb   :  { %s1220_s22 = smov [#allocation3]  }
   0xc   :  { %13 = dma.vmem_to_smem %s11_s20, 16, %s1220_s22, [#allocation2] }
   0xd   :  { %1190 = dma.done.wait [#allocation2], 16 }
   0xe   :  { %1191 = vsyncadd [#allocation2], 4294967280 }
   0xf   :  { %15 = sfence }
  0x10   :  { %16 = vsyncpa [#allocation5], 0 }
  0x11   :  { %18 = vsyncpa [#allocation5 + $0x1], 0  ;;  %s1255_s23 = smov 0   ;;  %s1257_s24 = smov 0  }
  0x12   :  { %s1259_s0 = smov 0   ;;  %s1261_s25 = smov 0  }
  0x13   :  { %s1263_s26 = smov 0   ;;  %s1265_s27 = smov 0  }
  0x14 LB: > { %1833 = sst [smem:[#allocation8_spill]] %s1206_s0  ;;  %s789_s28 = sadd.s32 4294967295, %s1218_s27   ;;  %s1218_s27 = sphi %s1265_s27, %s24_s27   ;;  %s1214_s26 = sphi %s1263_s26, %s1846_s26   ;;  %s1210_s25 = sphi %s1261_s25, %s1845_s25   ;;  %s1206_s0 = sphi %s1259_s0, %s1844_s0   ;;  %s1202_s24 = sphi %s1257_s24, %s1848_s24   ;;  %s1198_s23 = sphi %s1255_s23, %s1847_s23  }
  0x15   : > { %1834 = sst [smem:[#allocation9_spill]] %s1214_s26  ;;  %s790_s29 = sadd.s32 4294967294, %s1218_s27  }
  0x16   : > { %s36_s30 = sadd.s32 1, %s1214_s26  ;;  %s129_s6 = sadd.s32 1, %s1206_s0 }
  0x17   : > { %p38_p5 = scmp.ge.s32.totalorder %s36_s30, 2  ;;  %p139_p6 = scmp.ne.s32.totalorder %s1206_s0, %s1202_s24 }
  0x18   : > { %p140_p7 = scmp.eq.s32.totalorder %s789_s28, 1  ;;  %p145_p8 = scmp.ne.s32.totalorder %s1202_s24, %s1198_s23 }
  0x19   : > { %s1850_s30 = smov (%p38_p5, %s36_s30), 0  ;;  %p146_p10 = scmp.eq.s32.totalorder %s790_s29, 1 }
  0x1a   : > { %1835 = sst [smem:[#allocation10_spill]] %s1850_s30  ;;  %p1295_p9 = por %p140_p7, %p139_p6 }
  0x1b   : > { %s124_s8 = ssub.s32 %s1214_s26, %s1850_s30  ;;  %p792_p11 = scmp.ge.s32.totalorder %s1218_s27, 1 }
  0x1c   : > { %p127_p12 = scmp.eq.s32.totalorder %s124_s8, 0  ;;  %p1302_p13 = por %p146_p10, %p145_p8 }
  0x1d   : > { %p176_p0 = scmp.lt.s32.totalorder %s1218_s27, 3 }
  0x1e   : > { %s1308_s10 = scalar_select %p127_p12, %s1206_s0, %s129_s6  }
  0x1f   : > { %p177_p1 = pnand %p792_p11, %p176_p0 }
  0x20   : > { %1838 = sst [smem:[#allocation11_spill]] %s1308_s10  ;;  %s1839_s3 = sld [smem:[#allocation13_spill]] (!%p177_p1)  ;;  %v336_v47 = vlaneseq (!%p177_p1)  ;;  %vm663_vm0 = vcmask (!%p177_p1), 253952  }
  0x21   : > { %180 = sbr.rel (%p177_p1) target bundleno = 343 (0x157), region = 36  ;;  %s197_s28 = sshra.s32 (!%p177_p1), %s1210_s25, 1 }
  0x22   : > { %s200_s20 = sand.u32 (!%p177_p1), 1, %s1210_s25  ;;  %s801_s21 = sshll.u32 (!%p177_p1), %s197_s28, 4  ;;  %v1438_v61 = vshrl.u32 (!%p177_p1), %v336_v47, 7 }
  0x23   : > { %s1446_s6 = sadd.s32 (!%p177_p1), %s801_s21, %s200_s20  ;;  %s1840_s2 = sld [smem:[#allocation12_spill]] (!%p177_p1) }
  0x24   : > { %s1841_s4 = sld [smem:[#allocation14_spill]] (!%p177_p1)  ;;  %s796_s22 = sshll.u32 (!%p177_p1), %s1210_s25, 3 }
  0x25   : > { %s665_s8 = sadd.s32 (!%p177_p1), 1, %s796_s22  ;;  %s1726_s11 = sld [smem:[#allocation3 + %s796_s22]] (!%p177_p1) }
  0x26   : > { %v222_v0 = vld [vmem:[%s1839_s3 + $0x80] sm:$0xff] (!%p177_p1)  ;;  %v223_v1 = vld [vmem:[%s1839_s3 + $0x88] sm:$0xff] (!%p177_p1)  ;;  %v224_v11 = vld [vmem:[%s1839_s3 + $0x90] sm:$0xff] (!%p177_p1)  ;;  %s1728_s12 = sld [smem:[#allocation3 + %s665_s8]] (!%p177_p1)  ;;  %s677_s13 = sadd.s32 (!%p177_p1), 3, %s796_s22 }
  0x27   : > { %v206_v2 = vld [vmem:[%s1839_s3] sm:$0xff] (!%p177_p1)  ;;  %v942_v3 = vpack.c.bf16 (!%p177_p1), %v223_v1, %v222_v0  ;;  %v207_v4 = vld [vmem:[%s1839_s3 + $0x8] sm:$0xff] (!%p177_p1)  ;;  %v225_v13 = vld [vmem:[%s1839_s3 + $0x98] sm:$0xff] (!%p177_p1)  ;;  %s683_s28 = sadd.s32 (!%p177_p1), 4, %s796_s22  ;;  %s695_s20 = sadd.s32 (!%p177_p1), 6, %s796_s22 }
  0x28   : > { %v254_v5 = vld [vmem:[%s1839_s3 + $0x180] sm:$0xff]  ;;  %v255_v6 = vld [vmem:[%s1839_s3 + $0x188] sm:$0xff]  ;;  %v944_v7 = vpack.c.bf16 %v207_v4, %v206_v2  ;;  %v208_v14 = vld [vmem:[%s1839_s3 + $0x10] sm:$0xff]  ;;  %v946_v16 = vpack.c.bf16 %v225_v13, %v224_v11  ;;  %v350_v11 = vsub.s32 3, %v1438_v61  ;;  %s701_s21 = sadd.s32 7, %s796_s22  ;;  %s678_s15 = sld [smem:[#allocation3 + %s677_s13]] }
  0x29   : > { %v974_v8 = vpack.c.bf16 %v255_v6, %v254_v5  ;;  %v238_v9 = vld [vmem:[%s1839_s3 + $0x100] sm:$0xff]  ;;  %v239_v10 = vld [vmem:[%s1839_s3 + $0x108] sm:$0xff]  ;;  %943 = vmatprep.subr.bf16.mxu0 %v942_v3  ;;  %v209_v15 = vld [vmem:[%s1839_s3 + $0x18] sm:$0xff]  ;;  %s204_s29 = scalar_lea.vmem %s1840_s2, %s1446_s6  ;;  %s689_s6 = sadd.s32 5, %s796_s22 }
  0x2a   : > { %v976_v12 = vpack.c.bf16 %v239_v10, %v238_v9  ;;  %945 = vmatpush3.bf16.msra.mxu0 %v944_v7  ;;  %v948_v17 = vpack.c.bf16 %v209_v15, %v208_v14  ;;  %v256_v18 = vld [vmem:[%s1839_s3 + $0x190] sm:$0xff]  ;;  %v257_v19 = vld [vmem:[%s1839_s3 + $0x198] sm:$0xff]  ;;  %v226_v23 = vld [vmem:[%s1839_s3 + $0xa0] sm:$0xff]  ;;  %v342_v10 = vsub.s32 1, %v1438_v61  ;;  %s684_s16 = sld [smem:[#allocation3 + %s683_s28]]  ;;  %s1828_s17 = sand.u32 1, %s1202_s24  }
  0x2b   : > { %975 = vmatprep.subr.bf16.mxu1 %v974_v8  ;;  %v240_v20 = vld [vmem:[%s1839_s3 + $0x110] sm:$0xff]  ;;  %v978_v21 = vpack.c.bf16 %v257_v19, %v256_v18  ;;  %v241_v22 = vld [vmem:[%s1839_s3 + $0x118] sm:$0xff]  ;;  %v227_v24 = vld [vmem:[%s1839_s3 + $0xa8] sm:$0xff]  ;;  %947 = vmatprep.subr.bf16.mxu0 %v946_v16  ;;  %s690_s18 = sld [smem:[#allocation3 + %s689_s6]]  ;;  %s660_s8 = scalar_lea.vmem %s1821_s1, %s1726_s11 }
  0x2c   : > { %977 = vmatpush3.bf16.msra.mxu1 %v976_v12  ;;  %v980_v25 = vpack.c.bf16 %v241_v22, %v240_v20  ;;  %v950_v26 = vpack.c.bf16 %v227_v24, %v226_v23  ;;  %v210_v27 = vld [vmem:[%s1839_s3 + $0x20] sm:$0xff]  ;;  %v211_v28 = vld [vmem:[%s1839_s3 + $0x28] sm:$0xff]  ;;  %v228_v35 = vld [vmem:[%s1839_s3 + $0xb0] sm:$0xff]  ;;  %s696_s19 = sld [smem:[#allocation3 + %s695_s20]] }
  0x2d   : > { %v258_v29 = vld [vmem:[%s1839_s3 + $0x1a0] sm:$0xff]  ;;  %979 = vmatprep.subr.bf16.mxu1 %v978_v21  ;;  %v259_v30 = vld [vmem:[%s1839_s3 + $0x1a8] sm:$0xff]  ;;  %v952_v33 = vpack.c.bf16 %v211_v28, %v210_v27  ;;  %v229_v36 = vld [vmem:[%s1839_s3 + $0xb8] sm:$0xff]  ;;  %s702_s2 = sld [smem:[#allocation3 + %s701_s21]] }
  0x2e   : > { %v242_v31 = vld [vmem:[%s1839_s3 + $0x120] sm:$0xff]  ;;  %v243_v32 = vld [vmem:[%s1839_s3 + $0x128] sm:$0xff]  ;;  %949 = vmatpush3.bf16.msra.mxu0 %v948_v17  ;;  %v982_v34 = vpack.c.bf16 %v259_v30, %v258_v29  ;;  %v212_v37 = vld [vmem:[%s1839_s3 + $0x30] sm:$0xff]  ;;  %v954_v39 = vpack.c.bf16 %v229_v36, %v228_v35  ;;  %s679_s21 = scalar_lea.vmem %s1821_s1, %s678_s15 }
  0x2f   : > { %951 = vmatprep.subr.bf16.mxu0 %v950_v26  ;;  %v984_v38 = vpack.c.bf16 %v243_v32, %v242_v31  ;;  %v213_v40 = vld [vmem:[%s1839_s3 + $0x38] sm:$0xff]  ;;  %v260_v41 = vld [vmem:[%s1839_s3 + $0x1b0] sm:$0xff]  ;;  %v230_v46 = vld [vmem:[%s1839_s3 + $0xc0] sm:$0xff] }
  0x30   : > { %981 = vmatpush3.bf16.msra.mxu1 %v980_v25  ;;  %v261_v42 = vld [vmem:[%s1839_s3 + $0x1b8] sm:$0xff]  ;;  %v244_v44 = vld [vmem:[%s1839_s3 + $0x130] sm:$0xff]  ;;  %v231_v48 = vld [vmem:[%s1839_s3 + $0xc8] sm:$0xff]  ;;  %v956_v49 = vpack.c.bf16 %v213_v40, %v212_v37  ;;  %s685_s30 = scalar_lea.vmem %s1821_s1, %s684_s16  ;;  %s798_s16 = sshll.u32 %s1210_s25, 7 }
  0x31   : > { %983 = vmatprep.subr.bf16.mxu1 %v982_v34  ;;  %v986_v43 = vpack.c.bf16 %v261_v42, %v260_v41  ;;  %v245_v45 = vld [vmem:[%s1839_s3 + $0x138] sm:$0xff]  ;;  %v262_v50 = vld [vmem:[%s1839_s3 + $0x1c0] sm:$0xff]  ;;  %v263_v51 = vld [vmem:[%s1839_s3 + $0x1c8] sm:$0xff]  ;;  %v958_v53 = vpack.c.bf16 %v231_v48, %v230_v46  ;;  %s691_s10 = scalar_lea.vmem %s1821_s1, %s690_s18 }
  0x32   : > { %953 = vmatpush3.bf16.msra.mxu0 %v952_v33  ;;  %v988_v52 = vpack.c.bf16 %v245_v45, %v244_v44  ;;  %v214_v54 = vld [vmem:[%s1839_s3 + $0x40] sm:$0xff]  ;;  %v215_v55 = vld [vmem:[%s1839_s3 + $0x48] sm:$0xff]  ;;  %v990_v57 = vpack.c.bf16 %v263_v51, %v262_v50  ;;  %v232_v59 = vld [vmem:[%s1839_s3 + $0xd0] sm:$0xff] }
  0x33   : > { %955 = vmatprep.subr.bf16.mxu0 %v954_v39  ;;  %v246_v56 = vld [vmem:[%s1839_s3 + $0x140] sm:$0xff]  ;;  %v247_v58 = vld [vmem:[%s1839_s3 + $0x148] sm:$0xff]  ;;  %v233_v60 = vld [vmem:[%s1839_s3 + $0xd8] sm:$0xff]  ;;  %v960_v0 = vpack.c.bf16 %v215_v55, %v214_v54  ;;  %v338_v39 = vsub.s32 0, %v1438_v61  ;;  %s703_s15 = scalar_lea.vmem %s1821_s1, %s702_s2 }
  0x34   : > { %985 = vmatpush3.bf16.msra.mxu1 %v984_v38  ;;  %v264_v62 = vld [vmem:[%s1839_s3 + $0x1d0] sm:$0xff]  ;;  %v265_v63 = vld [vmem:[%s1839_s3 + $0x1d8] sm:$0xff]  ;;  %v992_v1 = vpack.c.bf16 %v247_v58, %v246_v56  ;;  %v962_v2 = vpack.c.bf16 %v233_v60, %v232_v59  ;;  %v234_v8 = vld [vmem:[%s1839_s3 + $0xe0] sm:$0xff] }
  0x35   : > { %987 = vmatprep.subr.bf16.mxu1 %v986_v43  ;;  %v216_v3 = vld [vmem:[%s1839_s3 + $0x50] sm:$0xff]  ;;  %v217_v4 = vld [vmem:[%s1839_s3 + $0x58] sm:$0xff]  ;;  %v994_v6 = vpack.c.bf16 %v265_v63, %v264_v62  ;;  %v235_v9 = vld [vmem:[%s1839_s3 + $0xe8] sm:$0xff]  ;;  %v346_v43 = vsub.s32 2, %v1438_v61 }
  0x36   : > { %957 = vmatpush3.bf16.msra.mxu0 %v956_v49  ;;  %v248_v5 = vld [vmem:[%s1839_s3 + $0x150] sm:$0xff]  ;;  %v249_v7 = vld [vmem:[%s1839_s3 + $0x158] sm:$0xff]  ;;  %v266_v12 = vld [vmem:[%s1839_s3 + $0x1e0] sm:$0xff]  ;;  %v964_v14 = vpack.c.bf16 %v217_v4, %v216_v3  ;;  %v966_v17 = vpack.c.bf16 %v235_v9, %v234_v8 }
  0x37   : > { %959 = vmatprep.subr.bf16.mxu0 %v958_v53  ;;  %v267_v13 = vld [vmem:[%s1839_s3 + $0x1e8] sm:$0xff]  ;;  %v218_v15 = vld [vmem:[%s1839_s3 + $0x60] sm:$0xff]  ;;  %v996_v16 = vpack.c.bf16 %v249_v7, %v248_v5  ;;  %v236_v23 = vld [vmem:[%s1839_s3 + $0xf0] sm:$0xff]  ;;  %v358_v53 = vsub.s32 5, %v1438_v61 }
  0x38   : > { %989 = vmatpush3.bf16.msra.mxu1 %v988_v52  ;;  %v219_v18 = vld [vmem:[%s1839_s3 + $0x68] sm:$0xff]  ;;  %v250_v19 = vld [vmem:[%s1839_s3 + $0x160] sm:$0xff]  ;;  %v998_v21 = vpack.c.bf16 %v267_v13, %v266_v12  ;;  %v237_v24 = vld [vmem:[%s1839_s3 + $0xf8] sm:$0xff] }
  0x39   : > { %991 = vmatprep.subr.bf16.mxu1 %v990_v57  ;;  %v1487_v20 = vld [vmem:[%s204_s29] ss:$2 sm:$0xff]  ;;  %v268_v27 = vld [vmem:[%s1839_s3 + $0x1f0] sm:$0xff]  ;;  %v269_v28 = vld [vmem:[%s1839_s3 + $0x1f8] sm:$0xff]  ;;  %v968_v29 = vpack.c.bf16 %v219_v18, %v218_v15  ;;  %v970_v31 = vpack.c.bf16 %v237_v24, %v236_v23  ;;  %v366_v57 = vsub.s32 7, %v1438_v61  ;;  %s671_s29 = sadd.s32 2, %s796_s22 }
  0x3a   : > { %961 = vmatpush3.bf16.msra.mxu0 %v960_v0  ;;  %v251_v22 = vld [vmem:[%s1839_s3 + $0x168] sm:$0xff]  ;;  %v343_v25 = vrot.slane %v1487_v20, %v342_v10  ;;  %v351_v26 = vrot.slane %v1487_v20, %v350_v11  ;;  %v220_v32 = vld [vmem:[%s1839_s3 + $0x70] sm:$0xff]  ;;  %v221_v33 = vld [vmem:[%s1839_s3 + $0x78] sm:$0xff]  ;;  %v1002_v35 = vpack.c.bf16 %v269_v28, %v268_v27  ;;  %v339_v54 = vrot.slane %v1487_v20, %v338_v39  ;;  %s672_s14 = sld [smem:[#allocation3 + %s671_s29]]  ;;  %s667_s29 = scalar_lea.vmem %s1821_s1, %s1728_s12 }
  0x3b   : > { %963 = vmatprep.subr.bf16.mxu0 %v962_v2  ;;  %v1000_v30 = vpack.c.bf16 %v251_v22, %v250_v19  ;;  %v252_v34 = vld [vmem:[%s1839_s3 + $0x170] sm:$0xff]  ;;  %v253_v36 = vld [vmem:[%s1839_s3 + $0x178] sm:$0xff]  ;;  %v286_v37 = vld [vmem:[%s1839_s3 + $0x280] sm:$0xff]  ;;  %v972_v42 = vpack.c.bf16 %v221_v33, %v220_v32  ;;  %v347_v59 = vrot.slane %v1487_v20, %v346_v43  ;;  %v367_v9 = vrot.slane %v1487_v20, %v366_v57 }
  0x3c   : > { %993 = vmatpush3.bf16.msra.mxu1 %v992_v1  ;;  %440 = vmatprep.mubr.f32.mxu0 %v343_v25  ;;  %v287_v38 = vld [vmem:[%s1839_s3 + $0x288] sm:$0xff]  ;;  %v318_v40 = vld [vmem:[%s1839_s3 + $0x380] sm:$0xff]  ;;  %v1004_v44 = vpack.c.bf16 %v253_v36, %v252_v34  ;;  %v288_v51 = vld [vmem:[%s1839_s3 + $0x290] sm:$0xff] }
  0x3d   : > { %995 = vmatprep.subr.bf16.mxu1 %v994_v6  ;;  %510 = vmatprep.mubr.f32.mxu1 %v351_v26  ;;  %v319_v41 = vld [vmem:[%s1839_s3 + $0x388] sm:$0xff]  ;;  %v1006_v45 = vpack.c.bf16 %v287_v38, %v286_v37  ;;  %v270_v46 = vld [vmem:[%s1839_s3 + $0x200] sm:$0xff]  ;;  %v289_v52 = vld [vmem:[%s1839_s3 + $0x298] sm:$0xff]  ;;  %v359_v6 = vrot.slane %v1487_v20, %v358_v53 }
  0x3e   : > { %965 = vmatpush3.bf16.msra.mxu0 %v964_v14  ;;  %v271_v47 = vld [vmem:[%s1839_s3 + $0x208] sm:$0xff]  ;;  %v302_v48 = vld [vmem:[%s1839_s3 + $0x300] sm:$0xff]  ;;  %v1038_v49 = vpack.c.bf16 %v319_v41, %v318_v40  ;;  %v320_v55 = vld [vmem:[%s1839_s3 + $0x390] sm:$0xff]  ;;  %v1010_v62 = vpack.c.bf16 %v289_v52, %v288_v51 }
  0x3f   : > { %967 = vmatprep.subr.bf16.mxu0 %v966_v17  ;;  %v303_v50 = vld [vmem:[%s1839_s3 + $0x308] sm:$0xff]  ;;  %v321_v56 = vld [vmem:[%s1839_s3 + $0x398] sm:$0xff]  ;;  %v1008_v58 = vpack.c.bf16 %v271_v47, %v270_v46  ;;  %v272_v63 = vld [vmem:[%s1839_s3 + $0x210] sm:$0xff] }
  0x40   : > { %997 = vmatpush3.bf16.msra.mxu1 %v996_v16  ;;  %v1040_v60 = vpack.c.bf16 %v303_v50, %v302_v48  ;;  %v273_v0 = vld [vmem:[%s1839_s3 + $0x218] sm:$0xff]  ;;  %v304_v1 = vld [vmem:[%s1839_s3 + $0x310] sm:$0xff]  ;;  %v1042_v2 = vpack.c.bf16 %v321_v56, %v320_v55  ;;  %v290_v4 = vld [vmem:[%s1839_s3 + $0x2a0] sm:$0xff]  ;;  %s673_s28 = scalar_lea.vmem %s1821_s1, %s672_s14  ;;  %s697_s14 = scalar_lea.vmem %s1821_s1, %s696_s19 }
  0x41   : > { %999 = vmatprep.subr.bf16.mxu1 %v998_v21  ;;  %v305_v3 = vld [vmem:[%s1839_s3 + $0x318] sm:$0xff]  ;;  %v291_v5 = vld [vmem:[%s1839_s3 + $0x2a8] sm:$0xff]  ;;  %v322_v7 = vld [vmem:[%s1839_s3 + $0x3a0] sm:$0xff]  ;;  %v1012_v10 = vpack.c.bf16 %v273_v0, %v272_v63  ;;  %s1763_s19 = scalar_lea.hbm %s1825_s5, %s798_s16 }
  0x42   : > { %969 = vmatpush3.bf16.msra.mxu0 %v968_v29  ;;  %v323_v8 = vld [vmem:[%s1839_s3 + $0x3a8] sm:$0xff]  ;;  %v1044_v11 = vpack.c.bf16 %v305_v3, %v304_v1  ;;  %v1014_v12 = vpack.c.bf16 %v291_v5, %v290_v4  ;;  %v274_v13 = vld [vmem:[%s1839_s3 + $0x220] sm:$0xff]  ;;  %v292_v18 = vld [vmem:[%s1839_s3 + $0x2b0] sm:$0xff] }
  0x43   : > { %971 = vmatprep.subr.bf16.mxu0 %v970_v31  ;;  %v275_v14 = vld [vmem:[%s1839_s3 + $0x228] sm:$0xff]  ;;  %v306_v15 = vld [vmem:[%s1839_s3 + $0x320] sm:$0xff]  ;;  %v1046_v16 = vpack.c.bf16 %v323_v8, %v322_v7  ;;  %v293_v19 = vld [vmem:[%s1839_s3 + $0x2b8] sm:$0xff] }
  0x44   : > { %1001 = vmatpush3.bf16.msra.mxu1 %v1000_v30  ;;  %v307_v17 = vld [vmem:[%s1839_s3 + $0x328] sm:$0xff]  ;;  %v324_v21 = vld [vmem:[%s1839_s3 + $0x3b0] sm:$0xff]  ;;  %v325_v22 = vld [vmem:[%s1839_s3 + $0x3b8] sm:$0xff]  ;;  %v1016_v23 = vpack.c.bf16 %v275_v14, %v274_v13  ;;  %v1018_v25 = vpack.c.bf16 %v293_v19, %v292_v18  ;;  %v362_v18 = vsub.s32 6, %v1438_v61 }
  0x45   : > { %1003 = vmatprep.subr.bf16.mxu1 %v1002_v35  ;;  %v1048_v24 = vpack.c.bf16 %v307_v17, %v306_v15  ;;  %v276_v26 = vld [vmem:[%s1839_s3 + $0x230] sm:$0xff]  ;;  %v277_v27 = vld [vmem:[%s1839_s3 + $0x238] sm:$0xff]  ;;  %v1050_v29 = vpack.c.bf16 %v325_v22, %v324_v21  ;;  %v294_v31 = vld [vmem:[%s1839_s3 + $0x2c0] sm:$0xff] }
  0x46   : > { %973 = vmatpush3.bf16.msra.mxu0 %v972_v42  ;;  %v308_v28 = vld [vmem:[%s1839_s3 + $0x330] sm:$0xff]  ;;  %v309_v30 = vld [vmem:[%s1839_s3 + $0x338] sm:$0xff]  ;;  %v295_v32 = vld [vmem:[%s1839_s3 + $0x2c8] sm:$0xff]  ;;  %v1020_v35 = vpack.c.bf16 %v277_v27, %v276_v26  ;;  %v363_v22 = vrot.slane %v1487_v20, %v362_v18 }
  0x47   : > { %1007 = vmatprep.subr.bf16.mxu0 %v1006_v45  ;;  %v326_v33 = vld [vmem:[%s1839_s3 + $0x3c0] sm:$0xff]  ;;  %v327_v34 = vld [vmem:[%s1839_s3 + $0x3c8] sm:$0xff]  ;;  %v1052_v36 = vpack.c.bf16 %v309_v30, %v308_v28  ;;  %v1022_v37 = vpack.c.bf16 %v295_v32, %v294_v31  ;;  %v296_v43 = vld [vmem:[%s1839_s3 + $0x2d0] sm:$0xff] }
  0x48   : > { %1005 = vmatpush3.bf16.msra.mxu1 %v1004_v44  ;;  %v278_v38 = vld [vmem:[%s1839_s3 + $0x240] sm:$0xff]  ;;  %v279_v39 = vld [vmem:[%s1839_s3 + $0x248] sm:$0xff]  ;;  %v1054_v41 = vpack.c.bf16 %v327_v34, %v326_v33  ;;  %v297_v44 = vld [vmem:[%s1839_s3 + $0x2d8] sm:$0xff] }
  0x49   : > { %1039 = vmatprep.subr.bf16.mxu1 %v1038_v49  ;;  %441 = vmatmul.mubr.f32.vlgmr.msra.gmra.mrb[0].mxu0 %v339_v54  ;;  %v310_v40 = vld [vmem:[%s1839_s3 + $0x340] sm:$0xff]  ;;  %v311_v42 = vld [vmem:[%s1839_s3 + $0x348] sm:$0xff]  ;;  %v328_v45 = vld [vmem:[%s1839_s3 + $0x3d0] sm:$0xff]  ;;  %v1024_v47 = vpack.c.bf16 %v279_v39, %v278_v38  ;;  %v1026_v49 = vpack.c.bf16 %v297_v44, %v296_v43 }
  0x4a   : > { %1009 = vmatpush3.bf16.msra.mxu0 %v1008_v58  ;;  %580 = vmatprep.mubr.f32.mxu0 %v359_v6  ;;  %v329_v46 = vld [vmem:[%s1839_s3 + $0x3d8] sm:$0xff]  ;;  %v1056_v48 = vpack.c.bf16 %v311_v42, %v310_v40  ;;  %v280_v50 = vld [vmem:[%s1839_s3 + $0x250] sm:$0xff]  ;;  %v298_v55 = vld [vmem:[%s1839_s3 + $0x2e0] sm:$0xff] }
  0x4b   : > { %511 = vmatmul.mubr.f32.vlgmr.msra.gmra.mrb[0].mxu1 %v347_v59  ;;  %1011 = vmatprep.subr.bf16.mxu0 %v1010_v62  ;;  %v281_v51 = vld [vmem:[%s1839_s3 + $0x258] sm:$0xff]  ;;  %v312_v52 = vld [vmem:[%s1839_s3 + $0x350] sm:$0xff]  ;;  %v1058_v53 = vpack.c.bf16 %v329_v46, %v328_v45  ;;  %v299_v56 = vld [vmem:[%s1839_s3 + $0x2e8] sm:$0xff] }
  0x4c   : > { %1041 = vmatpush3.bf16.msra.mxu1 %v1040_v60  ;;  %650 = vmatprep.mubr.f32.mxu1 %v367_v9  ;;  %v313_v54 = vld [vmem:[%s1839_s3 + $0x358] sm:$0xff]  ;;  %v330_v57 = vld [vmem:[%s1839_s3 + $0x3e0] sm:$0xff]  ;;  %v331_v58 = vld [vmem:[%s1839_s3 + $0x3e8] sm:$0xff]  ;;  %v1028_v59 = vpack.c.bf16 %v281_v51, %v280_v50  ;;  %v1030_v62 = vpack.c.bf16 %v299_v56, %v298_v55 }
  0x4d   : > { %1043 = vmatprep.subr.bf16.mxu1 %v1042_v2  ;;  %v1060_v60 = vpack.c.bf16 %v313_v54, %v312_v52  ;;  %v282_v63 = vld [vmem:[%s1839_s3 + $0x260] sm:$0xff]  ;;  %v283_v0 = vld [vmem:[%s1839_s3 + $0x268] sm:$0xff]  ;;  %v1062_v2 = vpack.c.bf16 %v331_v58, %v330_v57  ;;  %v300_v4 = vld [vmem:[%s1839_s3 + $0x2f0] sm:$0xff] }
  0x4e   : > { %1013 = vmatpush3.bf16.msra.mxu0 %v1012_v10  ;;  %v314_v1 = vld [vmem:[%s1839_s3 + $0x360] sm:$0xff]  ;;  %v315_v3 = vld [vmem:[%s1839_s3 + $0x368] sm:$0xff]  ;;  %v301_v5 = vld [vmem:[%s1839_s3 + $0x2f8] sm:$0xff]  ;;  %v1032_v8 = vpack.c.bf16 %v283_v0, %v282_v63 }
  0x4f   : > { %1015 = vmatprep.subr.bf16.mxu0 %v1014_v12  ;;  %v332_v6 = vld [vmem:[%s1839_s3 + $0x3f0] sm:$0xff]  ;;  %v333_v7 = vld [vmem:[%s1839_s3 + $0x3f8] sm:$0xff]  ;;  %v1064_v9 = vpack.c.bf16 %v315_v3, %v314_v1  ;;  %v1034_v10 = vpack.c.bf16 %v301_v5, %v300_v4  ;;  %v668_v38 = vld [vmem:[%s667_s29] sm:$0x1]  ;;  %s1221_s29 = smov [#allocation4]  }
  0x50   : > { %1045 = vmatpush3.bf16.msra.mxu1 %v1044_v11  ;;  %v284_v11 = vld [vmem:[%s1839_s3 + $0x270] sm:$0xff]  ;;  %v285_v12 = vld [vmem:[%s1839_s3 + $0x278] sm:$0xff]  ;;  %v1066_v13 = vpack.c.bf16 %v333_v7, %v332_v6  ;;  %v674_v39 = vld [vmem:[%s673_s28] sm:$0x1]  ;;  %s1142_s28 = sshll.u32 %s1221_s29, 4  ;;  %s1143_s28 = int_to_ptr.vmem [resolvable:$false] %s1142_s28 }
  0x51   : > { %1047 = vmatprep.subr.bf16.mxu1 %v1046_v16  ;;  %v316_v14 = vld [vmem:[%s1839_s3 + $0x370] sm:$0xff]  ;;  %v317_v15 = vld [vmem:[%s1839_s3 + $0x378] sm:$0xff]  ;;  %v354_v16 = vsub.s32 4, %v1438_v61  ;;  %v1036_v17 = vpack.c.bf16 %v285_v12, %v284_v11  ;;  %s793_s3 = sshll.u32 %s1828_s17, 3  ;;  %v680_v40 = vld [vmem:[%s679_s21] sm:$0x1] }
  0x52   : > { %1017 = vmatpush3.bf16.msra.mxu0 %v1016_v23  ;;  %v1068_v19 = vpack.c.bf16 %v317_v15, %v316_v14  ;;  %v692_v42 = vld [vmem:[%s691_s10] sm:$0x1]  ;;  %s196_s17 = scalar_lea.vmem [#allocation4], %s793_s3  ;;  %s1842_s3 = sand.u32 1, %s1202_s24  }
  0x53   : > { %1019 = vmatprep.subr.bf16.mxu0 %v1018_v25  ;;  %v355_v21 = vrot.slane %v1487_v20, %v354_v16  ;;  %v698_v44 = vld [vmem:[%s697_s14] sm:$0x1]  ;;  %s722_s18 = sshll.u32 %s196_s17, 4  ;;  %s708_s25 = scalar_lea.sflag [#allocation5], %s1842_s3  ;;  %s1765_s18 = int_to_ptr.vmem [resolvable:$true] %s722_s18 }
  0x54   : > { %1049 = vmatpush3.bf16.msra.mxu1 %v1048_v24  ;;  %v334_v24 = vld [vmem:[%s1841_s4] sm:$0x1]  ;;  %s1144_s6 = scalar_lea.vmem %s1143_s28, 256  ;;  %p1145_p5 = scmp.lt.s32.totalorder %s1765_s18, %s1143_s28 }
  0x55   : > { %1051 = vmatprep.subr.bf16.mxu1 %v1050_v29  ;;  %v704_v45 = vld [vmem:[%s703_s15] sm:$0x1] }
  0x56   : > { %1021 = vmatpush3.bf16.msra.mxu0 %v1020_v35 }
  0x57   : > { %1023 = vmatprep.subr.bf16.mxu0 %v1022_v37  ;;  %v661_v37 = vld [vmem:[%s660_s8] sm:$0x1]  ;;  %s1138_s8 = scalar_lea.vmem %s1765_s18, 128 }
  0x58   : > { %1053 = vmatpush3.bf16.msra.mxu1 %v1052_v36  ;;  %p1139_p2 = scmp.ne.s32.totalorder %s1765_s18, %s1138_s8  ;;  %p1146_p6 = scmp.lt.s32.totalorder %s1144_s6, %s1138_s8 }
  0x59   : > { %1055 = vmatprep.subr.bf16.mxu1 %v1054_v41  ;;  %v686_v41 = vld [vmem:[%s685_s30] sm:$0x1] }
  0x5a   : > { %1025 = vmatpush3.bf16.msra.mxu0 %v1024_v47  ;;  %p1140_p3 = pnand %p1139_p2, %p1295_p9  ;;  %p1147_p7 = por %p1146_p6, %p1145_p5 }
  0x5b   : > { %1027 = vmatprep.subr.bf16.mxu0 %v1026_v49 }
  0x5c   : > { %1057 = vmatpush3.bf16.msra.mxu1 %v1056_v48  ;;  %p1141_p4 = pneg %p1140_p3 }
  0x5d   : > { %1059 = vmatprep.subr.bf16.mxu1 %v1058_v53 }
  0x5e   : > { %1029 = vmatpush3.bf16.msra.mxu0 %v1028_v59  ;;  %p1148_p8 = pnand %p1147_p7, %p1141_p4 }
  0x5f   : > { %1031 = vmatprep.subr.bf16.mxu0 %v1030_v62 }
  0x60   : > { %1061 = vmatpush3.bf16.msra.mxu1 %v1060_v60 }
  0x61   : > { %1063 = vmatprep.subr.bf16.mxu1 %v1062_v2 }
  0x62   : > { %1033 = vmatpush3.bf16.msra.mxu0 %v1032_v8 }
  0x63   : > { %1035 = vmatprep.subr.bf16.mxu0 %v1034_v10 }
  0x64   : > { %1065 = vmatpush3.bf16.msra.mxu1 %v1064_v9 }
  0x65   : > { %1067 = vmatprep.subr.bf16.mxu1 %v1066_v13 }
  0x66   : > { %1037 = vmatpush3.bf16.msra.mxu0 %v1036_v17 }
  0x68   : > { %1069 = vmatpush3.bf16.msra.mxu1 %v1068_v19 }
  0x69   : > { %581 = vmatmul.mubr.f32.vlgmr.msra.gmra.mrb[2].mxu0 %v355_v21 }
  0x6b   : > { %651 = vmatmul.mubr.f32.vlgmr.msra.gmra.mrb[2].mxu1 %v363_v22 }
 0x11c   : > { %v834_v23 = vpop.f32.mrb[0].mxu0 }
 0x11d   : > { %v835_v25 = vpop.f32.mrb[1].mxu0 }
 0x11e   : > { %v869_v61 = vpop.f32.mrb[0].mxu1  ;;  %v836_v26 = vadd.f32 %v835_v25, %v834_v23 }
 0x11f   : > { %v870_v27 = vpop.f32.mrb[1].mxu1 }
 0x120   : > { %v871_v28 = vadd.f32 %v870_v27, %v869_v61  ;;  %v443_v29 = vadd.f32 %v836_v26, %v334_v24 }
 0x122   : > { %v513_v30 = vadd.f32 %v871_v28, %v443_v29 }
 0x13c   : > { %v904_v20 = vpop.f32.mrb[2].mxu0 }
 0x13d   : > { %v905_v31 = vpop.f32.mrb[3].mxu0 }
 0x13e   : > { %v939_v32 = vpop.f32.mrb[2].mxu1  ;;  %v906_v33 = vadd.f32 %v905_v31, %v904_v20 }
 0x13f   : > { %v940_v34 = vpop.f32.mrb[3].mxu1 }
 0x140   : > { %v941_v35 = vadd.f32 %v940_v34, %v939_v32  ;;  %v583_v36 = vadd.f32 %v906_v33, %v513_v30 }
 0x142   : > { %v653_v43 = vadd.f32 %v941_v35, %v583_v36 }
 0x144   : > { %v662_v46 = vadd.f32 %v661_v37, %v653_v43  ;;  %v669_v47 = vadd.f32 %v668_v38, %v653_v43  ;;  %v675_v48 = vadd.f32 %v674_v39, %v653_v43  ;;  %v681_v49 = vadd.f32 %v680_v40, %v653_v43 }
 0x145   : > { %v687_v50 = vadd.f32 %v686_v41, %v653_v43  ;;  %v693_v51 = vadd.f32 %v692_v42, %v653_v43  ;;  %v699_v52 = vadd.f32 %v698_v44, %v653_v43  ;;  %v705_v53 = vadd.f32 %v704_v45, %v653_v43 }
 0x146   : > { %664 = vst.msk [vmem:[%s196_s17] sm:$0x1] %vm663_vm0, %v662_v46  ;;  %670 = vst.msk [vmem:[%s196_s17 + $0x1] sm:$0x1] %vm663_vm0, %v669_v47 }
 0x147   : > { %676 = vst.msk [vmem:[%s196_s17 + $0x2] sm:$0x1] %vm663_vm0, %v675_v48  ;;  %682 = vst.msk [vmem:[%s196_s17 + $0x3] sm:$0x1] %vm663_vm0, %v681_v49 }
 0x148   : > { %688 = vst.msk [vmem:[%s196_s17 + $0x4] sm:$0x1] %vm663_vm0, %v687_v50  ;;  %694 = vst.msk [vmem:[%s196_s17 + $0x5] sm:$0x1] %vm663_vm0, %v693_v51 }
 0x149   : > { %700 = vst.msk [vmem:[%s196_s17 + $0x6] sm:$0x1] %vm663_vm0, %v699_v52  ;;  %706 = vst.msk [vmem:[%s196_s17 + $0x7] sm:$0x1] %vm663_vm0, %v705_v53 }
 0x14a   : > { %1151 = shalt.err (!%p1148_p8)
}
 0x14b   : > { %s1152_s20 = scalar_lea.hbm %s1763_s19, 128  ;;  %s1156_s30 = scalar_lea.hbm %s1825_s5, 256 }
 0x14c   : > { %p1153_p10 = scmp.ne.s32.totalorder %s1763_s19, %s1152_s20  ;;  %p1157_p0 = scmp.lt.u32.totalorder %s1763_s19, %s1825_s5 }
 0x14d   : > { %p1158_p1 = scmp.lt.u32.totalorder %s1156_s30, %s1152_s20  ;;  %p1160_p3 = scmp.lt.u32.totalorder %s1152_s20, %s1763_s19 }
 0x14e   : > { %p1154_p11 = pnand %p1153_p10, %p1295_p9 }
 0x14f   : > { %p1159_p2 = por %p1158_p1, %p1157_p0 }
 0x150   : > { %p1155_p12 = pneg %p1154_p11 }
 0x151   : > { %p1161_p4 = por %p1160_p3, %p1159_p2 }
 0x153   : > { %p1162_p5 = pnand %p1161_p4, %p1155_p12 }
 0x155   : > { %1165 = shalt.err (!%p1162_p5)
}
 0x156   : > { %1070 = dma.vmem_to_hbm [thread:$0]  (%p1295_p9), %s1765_s18, 128, %s1763_s19, %s708_s25  }
 0x157 PF: > { %p1076_p6 = scmp.ge.s32.totalorder %s1218_s27, 2  ;;  %s734_s10 = sand.u32 1, %s1198_s23  }
 0x158   : > { %s735_s12 = scalar_lea.sflag [#allocation5], %s734_s10 }
 0x159   : > { %p1073_p7 = pnand %p1076_p6, %p1302_p13 }
 0x15b   : > { %1193 = dma.done.wait (!%p1073_p7), %s735_s12, 128  }
 0x15c   : > { %1195 = vsyncadd (!%p1073_p7), %s735_s12, 4294967168  ;;  %s24_s27 = sadd.s32 1, %s1218_s27   ;;  %s1843_s14 = sld [smem:[#allocation8_spill]] }
 0x15d   : > { %p21_p8 = scmp.ge.s32.totalorder %s24_s27, 4   ;;  %s1844_s0 = sld [smem:[#allocation11_spill]] }
 0x15e   : > { %s1845_s25 = sld [smem:[#allocation9_spill]]  ;;  %s1846_s26 = sld [smem:[#allocation10_spill]] }
 0x15f   : > { %s1847_s23 = smov %s1202_s24  ;;  %23 = sbr.rel (!%p21_p8) target bundleno = 20 (0x14), region = 77 }
 0x162   : > { %s1848_s24 = smov %s1843_s14 }
 0x166   :  { %740 = vsyncpa [#allocation5], 1 }
 0x167   :  { %742 = vsyncpa [#allocation5 + $0x1], 1 }

</bundles_post_ra>
